<compile_context>
chip_gen: v5e
topology: v5e:2x2
jax: 0.10.0
libtpu: 0.0.40
codegen_flags: <defaults>
</compile_context>

<pallas_src>
import jax
import jax.numpy as jnp
from jax.experimental import pallas as pl
from jax.experimental.pallas import tpu as pltpu

# ---- small configuration consistent with the module ----
N_TOKEN = 128          # vocabulary size (multiple of 128 -> lane-aligned one-hot)
D_EMBEDDING = 32       # d_embedding
D_PROJECTION = 128     # d_projection != d_embedding -> projection branch active
BATCH = 2
SEQ = 16


def gather_matmul_kernel(idx_ref, table_ref, o_ref):
    """Embedding lookup (and fused projection) as ONE MXU matmul:

         out = one_hot(idx) @ table_ref

       table_ref is either
         * (n_token, d_proj)   bf16  table @ w_proj   (projection path, folded), or
         * (n_token, 128-pad)  f32   zero-padded table (pure lookup path, exact).

       The one-hot weights are exact 0/1 in either dtype; accumulation is f32.
       The result never touches scratch: it goes straight from the MXU to a single
       lane-dense (N multiple of 128) store.
    """
    bs = idx_ref.shape[0]
    n_tok = table_ref.shape[0]
    idx = idx_ref[...]                                               # (BS, 1) int32
    tok_iota = jax.lax.broadcasted_iota(jnp.int32, (bs, n_tok), 1)   # (BS, n_token)
    onehot = (tok_iota == idx).astype(table_ref.dtype)               # exact 0/1
    o_ref[...] = jnp.dot(onehot, table_ref[...],
                         preferred_element_type=jnp.float32)         # (BS, d_store) f32


def _run_gather(idx, table_x, d_store):
    bs = idx.shape[0]
    return pl.pallas_call(
        gather_matmul_kernel,
        out_shape=jax.ShapeDtypeStruct((bs, d_store), jnp.float32),
        in_specs=[pl.BlockSpec(memory_space=pltpu.MemorySpace.VMEM),
                  pl.BlockSpec(memory_space=pltpu.MemorySpace.VMEM)],
        out_specs=pl.BlockSpec(memory_space=pltpu.MemorySpace.VMEM),
    )(idx, table_x)


def adaptive_embedding(x, table, w_proj=None):
    """x: (B, S) int32 token ids
       table: (n_token, d_embedding) embedding weight
       w_proj: (d_embedding, d_projection) pre-transposed nn.Linear weight (no bias), or None.
    """
    B, S = x.shape
    d_emb = table.shape[1]
    idx = x.reshape(B * S, 1).astype(jnp.int32)

    if w_proj is not None:
        # Fold the bias-free projection into the table:
        #   onehot @ (table @ w_proj) == (onehot @ table) @ w_proj
        # Precompute in f32, then bf16 operands for the in-kernel MXU matmul.
        d_out = w_proj.shape[1]
        table_x = jnp.dot(table, w_proj,
                          preferred_element_type=jnp.float32).astype(jnp.bfloat16)
        out = _run_gather(idx, table_x, d_out)                       # (BS, d_proj) f32
        return out.reshape(B, S, d_out)

    # projection is None: exact f32 lookup; pad columns to a multiple of 128 so the
    # kernel's single store is lane-dense, then slice the padding back off here.
    d_store = max(128, -(-d_emb // 128) * 128)
    table_x = jnp.pad(table, ((0, 0), (0, d_store - d_emb)))
    out = _run_gather(idx, table_x, d_store)                         # (BS, d_store) f32
    return out[:, :d_emb].reshape(B, S, d_emb)


def reference(x, table, w_proj=None):
    emb = table[x]                      # (B, S, d_emb)
    if w_proj is None:
        return emb
    return emb @ w_proj                 # (B, S, d_proj)


if __name__ == "__main__":
    key = jax.random.PRNGKey(0)
    k1, k2, k3 = jax.random.split(key, 3)
    x = jax.random.randint(k1, (BATCH, SEQ), 0, N_TOKEN, dtype=jnp.int32)
    table = jax.random.normal(k2, (N_TOKEN, D_EMBEDDING), jnp.float32)
    w_proj = jax.random.normal(k3, (D_EMBEDDING, D_PROJECTION), jnp.float32) * 0.05

    # projection branch (d_embedding != d_projection): bf16 MXU matmul, f32 accumulation.
    out = jax.block_until_ready(adaptive_embedding(x, table, w_proj))
    ref = reference(x, table, w_proj)
    assert out.shape == (BATCH, SEQ, D_PROJECTION)
    err = float(jnp.max(jnp.abs(out - ref)))
    assert jnp.allclose(out, ref, atol=2e-2, rtol=2e-2), err

    # projection is None branch (pure embedding lookup): exact f32.
    out2 = jax.block_until_ready(adaptive_embedding(x, table, None))
    ref2 = reference(x, table, None)
    assert out2.shape == (BATCH, SEQ, D_EMBEDDING)
    assert jnp.allclose(out2, ref2, atol=1e-5, rtol=1e-5), float(jnp.max(jnp.abs(out2 - ref2)))

    print("KERNEL_OK")
</pallas_src>

<mosaic_0001>
module attributes {stable_mosaic.version = 11 : i64} {
  func.func @gather_matmul_kernel(%arg0: memref<32x1xi32, #tpu.memory_space<vmem>>, %arg1: memref<128x128xbf16, #tpu.memory_space<vmem>>, %arg2: memref<32x128xf32, #tpu.memory_space<vmem>>) attributes {dimension_semantics = [], scalar_prefetch = 0 : i64, scratch_operands = 0 : i64, tpu.core_type = #tpu.core_type<tc>} {
    %c0 = arith.constant 0 : index
    %c0_0 = arith.constant 0 : index
    %0 = vector.load %arg0[%c0, %c0_0] : memref<32x1xi32, #tpu.memory_space<vmem>>, vector<32x1xi32>
    %1 = tpu.iota {dimensions = array<i32: 1>} : vector<32x128xi32>
    %2 = vector.broadcast %0 : vector<32x1xi32> to vector<32x128xi32>
    %3 = arith.cmpi eq, %1, %2 : vector<32x128xi32>
    %4 = arith.extui %3 : vector<32x128xi1> to vector<32x128xi32>
    %5 = arith.sitofp %4 : vector<32x128xi32> to vector<32x128xf32>
    %6 = arith.truncf %5 : vector<32x128xf32> to vector<32x128xbf16>
    %c0_1 = arith.constant 0 : index
    %c0_2 = arith.constant 0 : index
    %7 = vector.load %arg1[%c0_1, %c0_2] : memref<128x128xbf16, #tpu.memory_space<vmem>>, vector<128x128xbf16>
    %cst = arith.constant dense<0.000000e+00> : vector<32x128xf32>
    %8 = tpu.matmul %6, %7, %cst {dimension_numbers = #tpu.dot_dimension_numbers<[1], [0], [0], [1], [0, 0, 1, 1], [], []>} : vector<32x128xbf16>, vector<128x128xbf16>, vector<32x128xf32> -> vector<32x128xf32>
    %c0_3 = arith.constant 0 : index
    %c0_4 = arith.constant 0 : index
    %9 = vector.load %arg2[%c0_3, %c0_4] : memref<32x128xf32, #tpu.memory_space<vmem>>, vector<32x128xf32>
    tpu.vector_store %arg2[%c0_3, %c0_4], %8 {strides = array<i32>} : memref<32x128xf32, #tpu.memory_space<vmem>>, vector<32x128xf32>,
    return
  }
}

</mosaic_0001>

<bundles_post_ra>
// kernel: tpu_custom_call.1
= control target key start
LH: loop header
LB: loop body
LE: loop exit
PB: predicated region body
PF: predicated region fallthrough
CT: control target
= control target key end

     0   :  { %7 = vsyncpa [#allocation3], 0  ;;  %s325_s0 = inlined_call_operand.vmem [shape: s32[32,1], index: 0, kind: input, shape index: {}]   ;;  %s326_s1 = inlined_call_operand.hbm [shape: bf16[128,128], index: 1, kind: input, shape index: {}]   ;;  %s327_s2 = inlined_call_operand.hbm [shape: f32[32,128], index: 2, kind: output, shape index: {}]  }
   0x1   :  { %8 = vsyncpa [#allocation4], 0  ;;  %s15_s11 = sshll.u32 %s326_s1, 4  ;;  %s284_s12 = smov [#allocation2]   ;;  %s16_s11 = int_to_ptr.hbm [resolvable:$true] %s15_s11 }
   0x2   :  { %s17_s13 = sshll.u32 %s284_s12, 4  ;;  %s285_s14 = smov 64   ;;  %s18_s13 = int_to_ptr.vmem [resolvable:$true] %s17_s13 }
   0x3   :  { %s286_s15 = smov 4  }
   0x4   :  { %23 = dma.hbm_to_vmem [thread:$0]  %s16_s11, 1024, %s18_s13, [#allocation3], %s285_s14, %s285_s14, %s286_s15  }
   0x5   :  { %280 = dma.done.wait [#allocation3], 1024  }
   0x6   :  { %281 = vsyncadd [#allocation3], 4294966272  ;;  %v287_v0 = vmov 0   ;;  %v30_v1 = vld [vmem:[%s325_s0 + $0x10] sm:$0xff]  ;;  %v28_v2 = vld [vmem:[%s325_s0] sm:$0xff]  ;;  %v32_v15 = vlaneseq  ;;  %s153_s26 = sshll.u32 %s327_s2, 4  ;;  %s154_s26 = int_to_ptr.hbm [resolvable:$true] %s153_s26 }
   0x7   :  { %231 = vset.pattern.permute.xlu1 %v287_v0  ;;  %230 = vset.pattern.permute.xlu0 %v287_v0  ;;  %v213_v3 = vld [vmem:[#allocation2 + $0x38] sm:$0xff]  ;;  %v212_v4 = vld [vmem:[#allocation2 + $0x30] sm:$0xff]  ;;  %v29_v6 = vld [vmem:[%s325_s0 + $0x8] sm:$0xff]  ;;  %v288_v19 = vmov 1.0|1.0   ;;  %s290_s27 = smov 128  }
   0x8   :  { %41 = vperm.xlu1 %231, %v30_v1   ;;  %35 = vperm.xlu0 %230, %v28_v2   ;;  %v31_v5 = vld [vmem:[%s325_s0 + $0x18] sm:$0xff]  ;;  %v211_v7 = vld [vmem:[#allocation2 + $0x28] sm:$0xff]  ;;  %v210_v8 = vld [vmem:[#allocation2 + $0x20] sm:$0xff]  ;;  %v33_v16 = vand.u32 127, %v32_v15  ;;  %s289_s0 = smov [#allocation5]   ;;  %s291_s28 = smov 8  }
   0x9   :  { %124 = vmatpush.bf16.msra.mxu0 %v213_v3  ;;  %214 = vmatpush.bf16.msra.mxu1 %v213_v3  ;;  %v209_v9 = vld [vmem:[#allocation2 + $0x18] sm:$0xff]  ;;  %v208_v10 = vld [vmem:[#allocation2 + $0x10] sm:$0xff]  ;;  %v207_v11 = vld [vmem:[#allocation2 + $0x8] sm:$0xff]  ;;  %s151_s23 = sshll.u32 %s289_s0, 4  ;;  %s152_s23 = int_to_ptr.vmem [resolvable:$true] %s151_s23 }
   0xa   :  { %v206_v12 = vld [vmem:[#allocation2] sm:$0xff] }
   0xd   :  { %125 = vmatpush.bf16.msra.mxu0 %v212_v4  ;;  %215 = vmatpush.bf16.msra.mxu1 %v212_v4 }
  0x10   :  { %44 = vperm.xlu1 %231, %v31_v5   ;;  %38 = vperm.xlu0 %230, %v29_v6  }
  0x11   :  { %126 = vmatpush.bf16.msra.mxu0 %v211_v7  ;;  %216 = vmatpush.bf16.msra.mxu1 %v211_v7 }
  0x15   :  { %127 = vmatpush.bf16.msra.mxu0 %v210_v8  ;;  %217 = vmatpush.bf16.msra.mxu1 %v210_v8 }
  0x19   :  { %128 = vmatpush.bf16.msra.mxu0 %v209_v9  ;;  %218 = vmatpush.bf16.msra.mxu1 %v209_v9 }
  0x1d   :  { %129 = vmatpush.bf16.msra.mxu0 %v208_v10  ;;  %219 = vmatpush.bf16.msra.mxu1 %v208_v10 }
  0x21   :  { %130 = vmatpush.bf16.msra.mxu0 %v207_v11  ;;  %220 = vmatpush.bf16.msra.mxu1 %v207_v11 }
  0x25   :  { %131 = vmatpush.bf16.msra.mxu0 %v206_v12  ;;  %221 = vmatpush.bf16.msra.mxu1 %v206_v12 }
  0x7a   :  { %v42_v13 = vpop.permute.xlu1 %41  ;;  %v36_v14 = vpop.permute.xlu0 %35 }
  0x7b   :  { %vm48_vm0 = vcmp.eq.s32.totalorder %v33_v16, %v42_v13  ;;  %vm46_vm3 = vcmp.eq.s32.totalorder %v33_v16, %v36_v14 }
  0x82   :  { %v45_v17 = vpop.permute.xlu1 %44  ;;  %v39_v18 = vpop.permute.xlu0 %38 }
  0x83   :  { %vm49_vm1 = vcmp.eq.s32.totalorder %v33_v16, %v45_v17  ;;  %vm47_vm2 = vcmp.eq.s32.totalorder %v33_v16, %v39_v18 }
  0x84   :  { %vm204_vm4 = vmpackc.low %vm49_vm1, %vm48_vm0 }
  0x85   :  { %vm202_vm5 = vmpackc.low %vm47_vm2, %vm46_vm3  ;;  %205 = vmatmul.msk.bf16.vlgmr.msra.gmra.mxu1 %vm204_vm4, %v288_v19 }
  0x86   :  { %203 = vmatmul.msk.bf16.vlgmr.msra.gmra.mxu0 %vm202_vm5, %v288_v19 }
 0x102   :  { %v138_v20 = vpop.f32.mrf.mxu1 }
 0x103   :  { %v133_v21 = vpop.f32.mrf.mxu0  ;;  %145 = vst [vmem:[#allocation5 + $0x10] sm:$0xff] %v138_v20 }
 0x104   :  { %143 = vst [vmem:[#allocation5] sm:$0xff] %v133_v21 }
 0x10a   :  { %v140_v22 = vpop.f32.mrf.mxu1 }
 0x10b   :  { %v135_v23 = vpop.f32.mrf.mxu0  ;;  %146 = vst [vmem:[#allocation5 + $0x18] sm:$0xff] %v140_v22 }
 0x10c   :  { %144 = vst [vmem:[#allocation5 + $0x8] sm:$0xff] %v135_v23 }
 0x10d   :  { %159 = dma.vmem_to_hbm [thread:$0]  %s152_s23, 512, %s154_s26, [#allocation4], %s290_s27, %s290_s27, %s291_s28  }
 0x10e   :  { %282 = dma.done.wait [#allocation4], 512  }
 0x10f   :  { %283 = vsyncadd [#allocation4], 4294966784 }
 0x110   :  { %164 = vsyncpa [#allocation3], 1 }
 0x111   :  { %165 = vsyncpa [#allocation4], 1 }

</bundles_post_ra>
